<compile_context>
chip_gen: v5e
topology: v5e:2x2
jax: 0.10.0
libtpu: 0.0.40
codegen_flags: <defaults>
</compile_context>

<pallas_src>
import numpy as np
import jax
import jax.numpy as jnp
from jax.experimental import pallas as pl
from jax.experimental.pallas import tpu as pltpu


# M-tile (lane dim of the output / patches blocks).  Multiple of 128.  512 keeps
# 2 inputs x 2 pipeline buffers x (K*tm) bf16 far below the 32 MiB default scoped VMEM
# limit even on v7x (64 MiB physical).  On v6e/v5e (128 MiB VMEM) this can be raised to
# 1024-2048 (optionally with pl.Buffered(3) on the patches spec) when sweeping.
TM_TARGET = 512


def _round_up(x, m):
    return (x + m - 1) // m * m


def _tile_m(m):
    """Return (tm, m_pad): lane-dense M tile and padded M so m_pad % tm == 0."""
    if m <= TM_TARGET:
        tm = _round_up(m, 128)
        return tm, tm
    m_pad = _round_up(m, TM_TARGET)
    return TM_TARGET, m_pad


# ----------------------------------------------------------------------------- kernels
def dyad_kernel(x_ref, w_ref, shift_ref, out_ref, acc_ref):
    """Fused Conv3d(k=3,s=1,p=1) + BN(eval) + ReLU + MaxPool3d(3,3) for one dyad.

    grid = (M_pad//tm, 27); axis 1 (pool tap) is the "arbitrary" reduction axis.

    x_ref:     [K, tm]      bf16 im2col features for the current pool-window tap
    w_ref:     [C_out, K]   bf16 conv weights with the BN scale pre-folded per channel
    shift_ref: [C_out, 1]   f32  (conv_bias - running_mean) * scale + beta
    out_ref:   [C_out, tm]  f32  pooled activations (lane-dense), written once per M tile
    acc_ref:   [C_out, tm]  f32  VMEM scratch running max over the 27 taps
    """
    p = pl.program_id(1)

    @pl.when(p == 0)
    def _():
        acc_ref[...] = jnp.full_like(acc_ref, -jnp.inf)

    # Conv-as-matmul on the MXU (bf16 x bf16 -> f32 accumulate), then max-pool reduce.
    y = jnp.dot(w_ref[...], x_ref[...], preferred_element_type=jnp.float32)
    acc_ref[...] = jnp.maximum(acc_ref[...], y)

    @pl.when(p == pl.num_programs(1) - 1)
    def _():
        # shift-add + ReLU hoisted out of the 27-tap loop (valid: shift is constant
        # across taps and ReLU is monotone, so relu(max(.)+shift) == max(relu(.+shift))).
        out_ref[...] = jnp.maximum(acc_ref[...] + shift_ref[...], 0.0)


def dense_kernel(x_ref, w_ref, b_ref, out_ref):
    """Linear(features, 1) + sigmoid as VPU multiply + row-sum (no width-1 MXU matmul).

    x_ref: [N, F] f32, w_ref: [1, F] f32, b_ref: [1, 1] f32, out_ref: [N, 1] f32.
    """
    z = jnp.sum(x_ref[...] * w_ref[...], axis=-1, keepdims=True) + b_ref[...]
    out_ref[...] = 1.0 / (1.0 + jnp.exp(-z))


# ----------------------------------------------------------------------------- wrappers
def run_dyad(patches, w_t, shift, *, tm):
    """patches: [27, K, M_pad] bf16, w_t: [C_out, K] bf16, shift: [C_out, 1] f32
    -> pooled [C_out, M_pad] f32."""
    _, k, m_pad = patches.shape
    c_out = w_t.shape[0]
    grid = (m_pad // tm, 27)

    flops = 2 * 27 * m_pad * k * c_out
    bytes_accessed = patches.size * 2 + w_t.size * 2 + shift.size * 4 + c_out * m_pad * 4

    return pl.pallas_call(
        dyad_kernel,
        out_shape=jax.ShapeDtypeStruct((c_out, m_pad), jnp.float32),
        grid_spec=pltpu.PrefetchScalarGridSpec(
            num_scalar_prefetch=0,
            grid=grid,
            in_specs=[
                # (K, tm) patch tile for pool tap p, M-tile i (double-buffered DMA).
                pl.BlockSpec((pl.Squeezed(), k, tm), lambda i, p: (p, 0, i)),
                # Weights / shift pinned in VMEM across the whole grid.
                pl.BlockSpec((c_out, k), lambda i, p: (0, 0)),
                pl.BlockSpec((c_out, 1), lambda i, p: (0, 0)),
            ],
            # Same output block across the tap axis -> VMEM-resident accumulator output.
            out_specs=pl.BlockSpec((c_out, tm), lambda i, p: (0, i)),
            scratch_shapes=[pltpu.VMEM((c_out, tm), jnp.float32)],
        ),
        compiler_params=pltpu.CompilerParams(
            dimension_semantics=("parallel", "arbitrary")),
        cost_estimate=pl.CostEstimate(
            flops=flops, transcendentals=0, bytes_accessed=bytes_accessed),
    )(patches, w_t, shift)


def run_dense(x, w_row, b):
    """x: [N, F] f32, w_row: [1, F] f32, b: [1, 1] f32 -> [N, 1] f32 (sigmoid probs)."""
    vmem = pl.BlockSpec(memory_space=pltpu.MemorySpace.VMEM)
    return pl.pallas_call(
        dense_kernel,
        out_shape=jax.ShapeDtypeStruct((x.shape[0], 1), jnp.float32),
        in_specs=[vmem, vmem, vmem],
        out_specs=vmem,
    )(x, w_row, b)


# ----------------------------------------------------------------------------- im2col glue
def im2col_pooled_t(x, dp, hp, wp, m_pad):
    """x: (N, C, D, H, W) f32 -> patches (27, C*27, m_pad) bf16 (lane-dense M last).

    Leading 27 enumerates the 3x3x3 max-pool window positions (pd*9+ph*3+pw); feature
    index = c*27 + kd*9 + kh*3 + kw (PyTorch Conv3d weight-flatten order); trailing axis
    is (n, d', h', w') flattened and zero-padded to m_pad."""
    n, c = x.shape[0], x.shape[1]
    dc, hc, wc = 3 * dp, 3 * hp, 3 * wp          # conv outputs surviving the floor-pool crop
    xp = jnp.pad(x, ((0, 0), (0, 0), (1, 1), (1, 1), (1, 1)))   # conv padding = 1
    slabs = [xp[:, :, kd:kd + dc, kh:kh + hc, kw:kw + wc]
             for kd in range(3) for kh in range(3) for kw in range(3)]
    feat = jnp.stack(slabs, axis=2)                       # (N, C, tap, Dc, Hc, Wc)
    feat = feat.reshape(n, c, 27, dp, 3, hp, 3, wp, 3)    # split pool windows
    feat = jnp.transpose(feat, (4, 6, 8, 1, 2, 0, 3, 5, 7))  # (pd,ph,pw, C,tap, N,dp,hp,wp)
    feat = feat.reshape(27, c * 27, n * dp * hp * wp)
    m = n * dp * hp * wp
    if m_pad > m:
        feat = jnp.pad(feat, ((0, 0), (0, 0), (0, m_pad - m)))
    return feat.astype(jnp.bfloat16)


# ----------------------------------------------------------------------------- params
def init_params(key, num_dyads, in_shape, nkernels):
    c_in = in_shape[0]
    spatial = list(in_shape[1:])
    eps = 1e-5
    dyads = []
    for d in range(num_dyads):
        ic = c_in if d == 0 else nkernels[d - 1]
        oc = nkernels[d]
        key, kw_, kb, kg, kbe, km, kv = jax.random.split(key, 7)
        w = 0.1 * jax.random.normal(kw_, (oc, ic, 3, 3, 3), jnp.float32)       # Conv3d.weight
        b = 0.1 * jax.random.normal(kb, (oc,), jnp.float32)                    # Conv3d.bias
        gamma = 1.0 + 0.1 * jax.random.normal(kg, (oc,), jnp.float32)          # BN weight
        beta = 0.1 * jax.random.normal(kbe, (oc,), jnp.float32)                # BN bias
        mean = 0.1 * jax.random.normal(km, (oc,), jnp.float32)                 # running_mean
        var = 1.0 + 0.1 * jnp.abs(jax.random.normal(kv, (oc,), jnp.float32))   # running_var
        scale = gamma / jnp.sqrt(var + eps)
        shift = (b - mean) * scale + beta
        # BN scale folded into the weight columns (safe under the max-pool), bf16, [C_out, K].
        w_t = (w.reshape(oc, ic * 27) * scale[:, None]).astype(jnp.bfloat16)
        dyads.append(dict(w=w, scale=scale, w_t=w_t, shift=shift.reshape(oc, 1)))
        spatial = [s // 3 for s in spatial]
    feat = int(np.prod(spatial)) * nkernels[num_dyads - 1]
    key, kdw, kdb = jax.random.split(key, 3)
    wd = 0.1 * jax.random.normal(kdw, (feat, 1), jnp.float32)                  # Linear.weight.T
    bd = 0.1 * jax.random.normal(kdb, (1, 1), jnp.float32)                     # Linear.bias
    return dict(dyads=dyads, wd=wd, bd=bd)


# ----------------------------------------------------------------------------- forward
def dyadic_cnn3d_forward(x, params):
    """x: (N, C, D, H, W) float32 -> (N, 1) sigmoid probabilities."""
    for dy in params["dyads"]:
        n, _, dd, hh, ww = x.shape
        dp, hp, wp = dd // 3, hh // 3, ww // 3
        c_out = dy["w_t"].shape[0]
        m = n * dp * hp * wp
        tm, m_pad = _tile_m(m)
        patches = im2col_pooled_t(x, dp, hp, wp, m_pad)          # (27, K, M_pad) bf16
        pooled = run_dyad(patches, dy["w_t"], dy["shift"], tm=tm)  # (C_out, M_pad) f32
        pooled = pooled[:, :m]
        x = pooled.reshape(c_out, n, dp, hp, wp).transpose(1, 0, 2, 3, 4)  # back to NCDHW
    # Flatten (PyTorch C,D,H,W order) -> Dropout (eval: identity) -> Dense + sigmoid.
    flat = x.reshape(x.shape[0], -1)
    return run_dense(flat, params["wd"].T, params["bd"])


def reference_forward(x, params):
    """Pure-JAX f32 reference (true module semantics) for the correctness check."""
    for dy in params["dyads"]:
        c_out = dy["w"].shape[0]
        y = jax.lax.conv_general_dilated(
            x, dy["w"], window_strides=(1, 1, 1),
            padding=((1, 1), (1, 1), (1, 1)),
            dimension_numbers=("NCDHW", "OIDHW", "NCDHW"),
            precision=jax.lax.Precision.HIGHEST)
        y = y * dy["scale"].reshape(1, c_out, 1, 1, 1) + dy["shift"].reshape(1, c_out, 1, 1, 1)
        y = jnp.maximum(y, 0.0)
        x = jax.lax.reduce_window(y, -jnp.inf, jax.lax.max,
                                  (1, 1, 3, 3, 3), (1, 1, 3, 3, 3), "VALID")
    flat = x.reshape(x.shape[0], -1)
    z = jnp.dot(flat, params["wd"], precision=jax.lax.Precision.HIGHEST) + params["bd"]
    return jax.nn.sigmoid(z)


if __name__ == "__main__":
    key = jax.random.PRNGKey(0)
    key, kx, kp = jax.random.split(key, 3)

    num_dyads = 2
    nkernels = [4, 8, 16, 32]
    in_shape = [3, 9, 18, 18]          # [channels, frames, H, W]  (small shapes)
    batch = 2

    x = jax.random.normal(kx, (batch, *in_shape), jnp.float32)
    params = init_params(kp, num_dyads, list(in_shape), nkernels)

    fwd = jax.jit(dyadic_cnn3d_forward)    # jit fuses the im2col glue around the kernels
    out = jax.block_until_ready(fwd(x, params))
    ref = jax.block_until_ready(reference_forward(x, params))

    assert out.shape == (batch, 1), out.shape
    # Tolerance covers the intentional bf16 patch/weight quantization (f32 MXU accumulate).
    np.testing.assert_allclose(np.asarray(out), np.asarray(ref), rtol=3e-2, atol=3e-2)
    print("KERNEL_OK")
</pallas_src>

<mosaic_0001>
module attributes {stable_mosaic.version = 11 : i64} {
  func.func @dyad_kernel(%arg0: i32, %arg1: i32, %arg2: memref<1x81x256xbf16, #tpu.memory_space<vmem>>, %arg3: memref<4x81xbf16, #tpu.memory_space<vmem>>, %arg4: memref<4x1xf32, #tpu.memory_space<vmem>>, %arg5: memref<4x256xf32, #tpu.memory_space<vmem>>, %arg6: memref<4x256xf32, #tpu.memory_space<vmem>>) attributes {dimension_semantics = [#tpu.dimension_semantics<parallel>, #tpu.dimension_semantics<arbitrary>], iteration_bounds = array<i64: 1, 27>, scalar_prefetch = 0 : i64, scratch_operands = 1 : i64, tpu.core_type = #tpu.core_type<tc>, window_params = [{transform_indices = @transform_0, window_bounds = array<i64: 1, 81, 256>}, {pipeline_mode = #tpu.pipeline_mode<synchronous>, transform_indices = @transform_1, window_bounds = array<i64: 4, 81>}, {pipeline_mode = #tpu.pipeline_mode<synchronous>, transform_indices = @transform_2, window_bounds = array<i64: 4, 1>}, {transform_indices = @transform_3, window_bounds = array<i64: 4, 256>}]} {
    %c0_i32 = arith.constant 0 : i32
    %0 = arith.cmpi eq, %arg1, %c0_i32 : i32
    %1 = arith.extui %0 : i1 to i32
    %c0_i32_0 = arith.constant 0 : i32
    %2 = arith.cmpi ne, %1, %c0_i32_0 : i32
    scf.if %2 {
      %cst_10 = arith.constant 0xFF800000 : f32
      %13 = vector.broadcast %cst_10 : f32 to vector<4x256xf32>
      %c0_11 = arith.constant 0 : index
      %c0_12 = arith.constant 0 : index
      %14 = vector.load %arg6[%c0_11, %c0_12] : memref<4x256xf32, #tpu.memory_space<vmem>>, vector<4x256xf32>
      tpu.vector_store %arg6[%c0_11, %c0_12], %13 {strides = array<i32>} : memref<4x256xf32, #tpu.memory_space<vmem>>, vector<4x256xf32>,
    } else {
    }
    %c0 = arith.constant 0 : index
    %c0_1 = arith.constant 0 : index
    %3 = vector.load %arg3[%c0, %c0_1] : memref<4x81xbf16, #tpu.memory_space<vmem>>, vector<4x81xbf16>
    %c0_2 = arith.constant 0 : index
    %c0_3 = arith.constant 0 : index
    %c0_4 = arith.constant 0 : index
    %4 = vector.load %arg2[%c0_2, %c0_3, %c0_4] : memref<1x81x256xbf16, #tpu.memory_space<vmem>>, vector<1x81x256xbf16>
    %5 = vector.shape_cast %4 : vector<1x81x256xbf16> to vector<81x256xbf16>
    %cst = arith.constant dense<0.000000e+00> : vector<4x256xf32>
    %6 = tpu.matmul %3, %5, %cst {dimension_numbers = #tpu.dot_dimension_numbers<[1], [0], [0], [1], [0, 0, 1, 1], [], []>} : vector<4x81xbf16>, vector<81x256xbf16>, vector<4x256xf32> -> vector<4x256xf32>
    %c0_5 = arith.constant 0 : index
    %c0_6 = arith.constant 0 : index
    %7 = vector.load %arg6[%c0_5, %c0_6] : memref<4x256xf32, #tpu.memory_space<vmem>>, vector<4x256xf32>
    %8 = arith.maximumf %7, %6 : vector<4x256xf32>
    %c0_7 = arith.constant 0 : index
    %c0_8 = arith.constant 0 : index
    %9 = vector.load %arg6[%c0_7, %c0_8] : memref<4x256xf32, #tpu.memory_space<vmem>>, vector<4x256xf32>
    tpu.vector_store %arg6[%c0_7, %c0_8], %8 {strides = array<i32>} : memref<4x256xf32, #tpu.memory_space<vmem>>, vector<4x256xf32>,
    %c26_i32 = arith.constant 26 : i32
    %10 = arith.cmpi eq, %arg1, %c26_i32 : i32
    %11 = arith.extui %10 : i1 to i32
    %c0_i32_9 = arith.constant 0 : i32
    %12 = arith.cmpi ne, %11, %c0_i32_9 : i32
    scf.if %12 {
      %c0_10 = arith.constant 0 : index
      %c0_11 = arith.constant 0 : index
      %13 = vector.load %arg6[%c0_10, %c0_11] : memref<4x256xf32, #tpu.memory_space<vmem>>, vector<4x256xf32>
      %c0_12 = arith.constant 0 : index
      %c0_13 = arith.constant 0 : index
      %14 = vector.load %arg4[%c0_12, %c0_13] : memref<4x1xf32, #tpu.memory_space<vmem>>, vector<4x1xf32>
      %15 = vector.broadcast %14 : vector<4x1xf32> to vector<4x256xf32>
      %16 = arith.addf %13, %15 : vector<4x256xf32>
      %cst_14 = arith.constant 0.000000e+00 : f32
      %17 = vector.broadcast %cst_14 : f32 to vector<4x256xf32>
      %18 = arith.maximumf %16, %17 : vector<4x256xf32>
      %c0_15 = arith.constant 0 : index
      %c0_16 = arith.constant 0 : index
      %19 = vector.load %arg5[%c0_15, %c0_16] : memref<4x256xf32, #tpu.memory_space<vmem>>, vector<4x256xf32>
      tpu.vector_store %arg5[%c0_15, %c0_16], %18 {strides = array<i32>} : memref<4x256xf32, #tpu.memory_space<vmem>>, vector<4x256xf32>,
    } else {
    }
    return
  }
  func.func @transform_0(%arg0: i32, %arg1: i32) -> (i32, i32, i32) {
    %c0_i32 = arith.constant 0 : i32
    %c0_i32_0 = arith.constant 0 : i32
    return %arg1, %c0_i32, %arg0 : i32, i32, i32
  }
  func.func @transform_1(%arg0: i32, %arg1: i32) -> (i32, i32) {
    %c0_i32 = arith.constant 0 : i32
    %c0_i32_0 = arith.constant 0 : i32
    %c0_i32_1 = arith.constant 0 : i32
    return %c0_i32, %c0_i32_0 : i32, i32
  }
  func.func @transform_2(%arg0: i32, %arg1: i32) -> (i32, i32) {
    %c0_i32 = arith.constant 0 : i32
    %c0_i32_0 = arith.constant 0 : i32
    %c0_i32_1 = arith.constant 0 : i32
    return %c0_i32, %c0_i32_0 : i32, i32
  }
  func.func @transform_3(%arg0: i32, %arg1: i32) -> (i32, i32) {
    %c0_i32 = arith.constant 0 : i32
    %c0_i32_0 = arith.constant 0 : i32
    return %c0_i32, %arg0 : i32, i32
  }
}

module attributes {stable_mosaic.version = 11 : i64} {
  func.func @dyad_kernel(%arg0: i32, %arg1: i32, %arg2: memref<1x108x128xbf16, #tpu.memory_space<vmem>>, %arg3: memref<8x108xbf16, #tpu.memory_space<vmem>>, %arg4: memref<8x1xf32, #tpu.memory_space<vmem>>, %arg5: memref<8x128xf32, #tpu.memory_space<vmem>>, %arg6: memref<8x128xf32, #tpu.memory_space<vmem>>) attributes {dimension_semantics = [#tpu.dimension_semantics<parallel>, #tpu.dimension_semantics<arbitrary>], iteration_bounds = array<i64: 1, 27>, scalar_prefetch = 0 : i64, scratch_operands = 1 : i64, tpu.core_type = #tpu.core_type<tc>, window_params = [{transform_indices = @transform_0, window_bounds = array<i64: 1, 108, 128>}, {pipeline_mode = #tpu.pipeline_mode<synchronous>, transform_indices = @transform_1, window_bounds = array<i64: 8, 108>}, {pipeline_mode = #tpu.pipeline_mode<synchronous>, transform_indices = @transform_2, window_bounds = array<i64: 8, 1>}, {transform_indices = @transform_3, window_bounds = array<i64: 8, 128>}]} {
    %c0_i32 = arith.constant 0 : i32
    %0 = arith.cmpi eq, %arg1, %c0_i32 : i32
    %1 = arith.extui %0 : i1 to i32
    %c0_i32_0 = arith.constant 0 : i32
    %2 = arith.cmpi ne, %1, %c0_i32_0 : i32
    scf.if %2 {
      %cst_10 = arith.constant 0xFF800000 : f32
      %13 = vector.broadcast %cst_10 : f32 to vector<8x128xf32>
      %c0_11 = arith.constant 0 : index
      %c0_12 = arith.constant 0 : index
      %14 = vector.load %arg6[%c0_11, %c0_12] : memref<8x128xf32, #tpu.memory_space<vmem>>, vector<8x128xf32>
      tpu.vector_store %arg6[%c0_11, %c0_12], %13 {strides = array<i32>} : memref<8x128xf32, #tpu.memory_space<vmem>>, vector<8x128xf32>,
    } else {
    }
    %c0 = arith.constant 0 : index
    %c0_1 = arith.constant 0 : index
    %3 = vector.load %arg3[%c0, %c0_1] : memref<8x108xbf16, #tpu.memory_space<vmem>>, vector<8x108xbf16>
    %c0_2 = arith.constant 0 : index
    %c0_3 = arith.constant 0 : index
    %c0_4 = arith.constant 0 : index
    %4 = vector.load %arg2[%c0_2, %c0_3, %c0_4] : memref<1x108x128xbf16, #tpu.memory_space<vmem>>, vector<1x108x128xbf16>
    %5 = vector.shape_cast %4 : vector<1x108x128xbf16> to vector<108x128xbf16>
    %cst = arith.constant dense<0.000000e+00> : vector<8x128xf32>
    %6 = tpu.matmul %3, %5, %cst {dimension_numbers = #tpu.dot_dimension_numbers<[1], [0], [0], [1], [0, 0, 1, 1], [], []>} : vector<8x108xbf16>, vector<108x128xbf16>, vector<8x128xf32> -> vector<8x128xf32>
    %c0_5 = arith.constant 0 : index
    %c0_6 = arith.constant 0 : index
    %7 = vector.load %arg6[%c0_5, %c0_6] : memref<8x128xf32, #tpu.memory_space<vmem>>, vector<8x128xf32>
    %8 = arith.maximumf %7, %6 : vector<8x128xf32>
    %c0_7 = arith.constant 0 : index
    %c0_8 = arith.constant 0 : index
    %9 = vector.load %arg6[%c0_7, %c0_8] : memref<8x128xf32, #tpu.memory_space<vmem>>, vector<8x128xf32>
    tpu.vector_store %arg6[%c0_7, %c0_8], %8 {strides = array<i32>} : memref<8x128xf32, #tpu.memory_space<vmem>>, vector<8x128xf32>,
    %c26_i32 = arith.constant 26 : i32
    %10 = arith.cmpi eq, %arg1, %c26_i32 : i32
    %11 = arith.extui %10 : i1 to i32
    %c0_i32_9 = arith.constant 0 : i32
    %12 = arith.cmpi ne, %11, %c0_i32_9 : i32
    scf.if %12 {
      %c0_10 = arith.constant 0 : index
      %c0_11 = arith.constant 0 : index
      %13 = vector.load %arg6[%c0_10, %c0_11] : memref<8x128xf32, #tpu.memory_space<vmem>>, vector<8x128xf32>
      %c0_12 = arith.constant 0 : index
      %c0_13 = arith.constant 0 : index
      %14 = vector.load %arg4[%c0_12, %c0_13] : memref<8x1xf32, #tpu.memory_space<vmem>>, vector<8x1xf32>
      %15 = vector.broadcast %14 : vector<8x1xf32> to vector<8x128xf32>
      %16 = arith.addf %13, %15 : vector<8x128xf32>
      %cst_14 = arith.constant 0.000000e+00 : f32
      %17 = vector.broadcast %cst_14 : f32 to vector<8x128xf32>
      %18 = arith.maximumf %16, %17 : vector<8x128xf32>
      %c0_15 = arith.constant 0 : index
      %c0_16 = arith.constant 0 : index
      %19 = vector.load %arg5[%c0_15, %c0_16] : memref<8x128xf32, #tpu.memory_space<vmem>>, vector<8x128xf32>
      tpu.vector_store %arg5[%c0_15, %c0_16], %18 {strides = array<i32>} : memref<8x128xf32, #tpu.memory_space<vmem>>, vector<8x128xf32>,
    } else {
    }
    return
  }
  func.func @transform_0(%arg0: i32, %arg1: i32) -> (i32, i32, i32) {
    %c0_i32 = arith.constant 0 : i32
    %c0_i32_0 = arith.constant 0 : i32
    return %arg1, %c0_i32, %arg0 : i32, i32, i32
  }
  func.func @transform_1(%arg0: i32, %arg1: i32) -> (i32, i32) {
    %c0_i32 = arith.constant 0 : i32
    %c0_i32_0 = arith.constant 0 : i32
    %c0_i32_1 = arith.constant 0 : i32
    return %c0_i32, %c0_i32_0 : i32, i32
  }
  func.func @transform_2(%arg0: i32, %arg1: i32) -> (i32, i32) {
    %c0_i32 = arith.constant 0 : i32
    %c0_i32_0 = arith.constant 0 : i32
    %c0_i32_1 = arith.constant 0 : i32
    return %c0_i32, %c0_i32_0 : i32, i32
  }
  func.func @transform_3(%arg0: i32, %arg1: i32) -> (i32, i32) {
    %c0_i32 = arith.constant 0 : i32
    %c0_i32_0 = arith.constant 0 : i32
    return %c0_i32, %arg0 : i32, i32
  }
}

module attributes {stable_mosaic.version = 11 : i64} {
  func.func @dense_kernel(%arg0: memref<2x32xf32, #tpu.memory_space<vmem>>, %arg1: memref<1x32xf32, #tpu.memory_space<vmem>>, %arg2: memref<1x1xf32, #tpu.memory_space<vmem>>, %arg3: memref<2x1xf32, #tpu.memory_space<vmem>>) attributes {dimension_semantics = [], scalar_prefetch = 0 : i64, scratch_operands = 0 : i64, tpu.core_type = #tpu.core_type<tc>} {
    %c0 = arith.constant 0 : index
    %c0_0 = arith.constant 0 : index
    %0 = vector.load %arg0[%c0, %c0_0] : memref<2x32xf32, #tpu.memory_space<vmem>>, vector<2x32xf32>
    %c0_1 = arith.constant 0 : index
    %c0_2 = arith.constant 0 : index
    %1 = vector.load %arg1[%c0_1, %c0_2] : memref<1x32xf32, #tpu.memory_space<vmem>>, vector<1x32xf32>
    %2 = vector.broadcast %1 : vector<1x32xf32> to vector<2x32xf32>
    %3 = arith.mulf %0, %2 : vector<2x32xf32>
    %cst = arith.constant dense<0.000000e+00> : vector<2xf32>
    %4 = vector.multi_reduction <add>, %3, %cst [1] : vector<2x32xf32> to vector<2xf32>
    %5 = vector.shape_cast %4 : vector<2xf32> to vector<2x1xf32>
    %c0_3 = arith.constant 0 : index
    %c0_4 = arith.constant 0 : index
    %6 = vector.load %arg2[%c0_3, %c0_4] : memref<1x1xf32, #tpu.memory_space<vmem>>, vector<1x1xf32>
    %7 = vector.broadcast %6 : vector<1x1xf32> to vector<2x1xf32>
    %8 = arith.addf %5, %7 : vector<2x1xf32>
    %cst_5 = arith.constant 0.000000e+00 : f32
    %9 = vector.broadcast %cst_5 : f32 to vector<2x1xf32>
    %10 = arith.subf %9, %8 : vector<2x1xf32>
    %11 = math.exp %10 : vector<2x1xf32>
    %cst_6 = arith.constant 1.000000e+00 : f32
    %12 = vector.broadcast %cst_6 : f32 to vector<2x1xf32>
    %13 = arith.addf %12, %11 : vector<2x1xf32>
    %cst_7 = arith.constant 1.000000e+00 : f32
    %14 = vector.broadcast %cst_7 : f32 to vector<2x1xf32>
    %15 = arith.divf %14, %13 : vector<2x1xf32>
    %c0_8 = arith.constant 0 : index
    %c0_9 = arith.constant 0 : index
    %16 = vector.load %arg3[%c0_8, %c0_9] : memref<2x1xf32, #tpu.memory_space<vmem>>, vector<2x1xf32>
    tpu.vector_store %arg3[%c0_8, %c0_9], %15 {strides = array<i32>} : memref<2x1xf32, #tpu.memory_space<vmem>>, vector<2x1xf32>,
    return
  }
}

</mosaic_0001>

<bundles_post_ra>
// kernel: dyadic_cnn3d_forward.3
= control target key start
LH: loop header
LB: loop body
LE: loop exit
PB: predicated region body
PF: predicated region fallthrough
CT: control target
= control target key end

     0   :  { %s548_s12 = smov 0   ;;  %s550_s13 = smov 0   ;;  %s616_s0 = inlined_call_operand.vmem [shape: bf16[27,81,256], index: 0, kind: input, shape index: {}]   ;;  %s617_s1 = inlined_call_operand.vmem [shape: bf16[4,81], index: 1, kind: input, shape index: {}]   ;;  %s618_s2 = inlined_call_operand.vmem [shape: f32[4,1], index: 2, kind: input, shape index: {}]   ;;  %s619_s3 = inlined_call_operand.vmem [shape: f32[4,256], index: 3, kind: output, shape index: {}]  }
   0x1   :  { %s552_s14 = smov 0  }
   0x2 LB: > { %s22_s15 = sadd.s32 1, %s518_s13  ;;  %p410_p0 = scmp.ge.s32.totalorder %s522_s14, 1  ;;  %s522_s14 = sphi %s552_s14, %s13_s14   ;;  %s518_s13 = sphi %s550_s13, %s621_s13   ;;  %s514_s12 = sphi %s548_s12, %s620_s12  }
   0x3   : > { %p23_p1 = scmp.ge.s32.totalorder %s22_s15, 27  ;;  %p156_p2 = scmp.lt.s32.totalorder %s522_s14, 28 }
   0x5   : > { %s623_s15 = smov (%p23_p1, %s22_s15), 0  ;;  %p157_p3 = pnand %p410_p0, %p156_p2 }
   0x6   : > { %p185_p4 = scmp.lt.s32.totalorder (!%p157_p3), %s514_s12, 26  ;;  %p412_p5 = scmp.ne.s32.totalorder (!%p157_p3), %s514_s12, 0 }
   0x7   : > { %160 = sbr.rel (%p157_p3) target bundleno = 308 (0x134), region = 32 }
   0xc   : > { %s186_s16 = scalar_select %p185_p4, %s514_s12, 26 }
   0xd   : > { %204 = sbr.rel (%p412_p5) target bundleno = 20 (0x14), region = 36 }
   0xe   : > { %s470_s17 = smul.u32 88, %s186_s16 }
  0x10   : > { %s573_s20 = scalar_lea.vmem %s616_s0, %s470_s17 }
  0x12   : > { %v524_v0 = vmov -inf  }
  0x13   : > { %205 = vst [vmem:[#allocation2] sm:$0xff] %v524_v0 }
  0x14 PF: > { %v217_v1 = vld [vmem:[%s573_s20 + $0x50] sm:$0x11]  ;;  %vm277_vm0 = vcmask 1040384   ;;  %v525_v4 = vmov 0   ;;  %v447_v8 = vld [vmem:[%s573_s20 + $0x40] sm:$0xf] }
  0x15   : > { %v249_v2 = vunpack.c.l.b16 %v217_v1  ;;  %v250_v3 = vunpack.c.h.b16 %v217_v1  ;;  %v279_v5 = vsel %vm277_vm0, 65535, %v525_v4  ;;  %v469_v9 = vld [vmem:[%s573_s20 + $0x44] sm:$0xf0]  ;;  %v468_v10 = vld [vmem:[%s573_s20 + $0x44] sm:$0xf]  ;;  %vm273_vm1 = vcmask 662528  }
  0x16   : > { %v449_v11 = vld [vmem:[%s573_s20 + $0x48] sm:$0xf0]  ;;  %v448_v14 = vor.u32 %v469_v9, %v447_v8  ;;  %v439_v16 = vld [vmem:[%s573_s20 + $0x30] sm:$0xf]  ;;  %v467_v17 = vld [vmem:[%s573_s20 + $0x34] sm:$0xf0] }
  0x17   : > { %v261_v6 = vpack.c.b16 %v249_v2, %v249_v2  ;;  %v262_v7 = vpack.c.b16 %v250_v3, %v250_v3  ;;  %v452_v15 = vor.u32 %v468_v10, %v449_v11  ;;  %v466_v18 = vld [vmem:[%s573_s20 + $0x34] sm:$0xf]  ;;  %v441_v19 = vld [vmem:[%s573_s20 + $0x38] sm:$0xf0]  ;;  %v440_v20 = vor.u32 %v467_v17, %v439_v16  ;;  %v431_v22 = vld [vmem:[%s573_s20 + $0x20] sm:$0xf] }
  0x18   : > { %v444_v21 = vor.u32 %v466_v18, %v441_v19  ;;  %v465_v23 = vld [vmem:[%s573_s20 + $0x24] sm:$0xf0]  ;;  %v464_v24 = vld [vmem:[%s573_s20 + $0x24] sm:$0xf]  ;;  %v433_v25 = vld [vmem:[%s573_s20 + $0x28] sm:$0xf0] }
  0x19   : > { %v281_v12 = vand.u32 %v279_v5, %v261_v6  ;;  %v284_v13 = vand.u32 %v279_v5, %v262_v7  ;;  %v432_v26 = vor.u32 %v465_v23, %v431_v22  ;;  %v436_v27 = vor.u32 %v464_v24, %v433_v25  ;;  %v423_v28 = vld [vmem:[%s573_s20 + $0x10] sm:$0xf]  ;;  %v463_v29 = vld [vmem:[%s573_s20 + $0x14] sm:$0xf0]  ;;  %v462_v30 = vld [vmem:[%s573_s20 + $0x14] sm:$0xf] }
  0x1a   : > { %v425_v31 = vld [vmem:[%s573_s20 + $0x18] sm:$0xf0]  ;;  %v424_v32 = vor.u32 %v463_v29, %v423_v28  ;;  %v415_v34 = vld [vmem:[%s573_s20] sm:$0xf]  ;;  %v461_v35 = vld [vmem:[%s573_s20 + $0x4] sm:$0xf0] }
  0x1b   : > { %288 = vmatpush.bf16.msra.mxu0 %v281_v12  ;;  %301 = vmatpush.bf16.msra.mxu1 %v284_v13  ;;  %v428_v33 = vor.u32 %v462_v30, %v425_v31  ;;  %v460_v36 = vld [vmem:[%s573_s20 + $0x4] sm:$0xf]  ;;  %v417_v37 = vld [vmem:[%s573_s20 + $0x8] sm:$0xf0]  ;;  %v416_v38 = vor.u32 %v461_v35, %v415_v34  ;;  %v206_v40 = vld [vmem:[%s617_s1] sm:$0x3] }
  0x1c   : > { %v420_v39 = vor.u32 %v460_v36, %v417_v37  ;;  %vm316_vm2 = vcmask 1043456   ;;  %v312_v43 = vld [vmem:[#allocation2] sm:$0xff]  ;;  %p455_p6 = scmp.ne.s32.totalorder %s514_s12, 26 }
  0x1f   : > { %289 = vmatpush.bf16.msra.mxu0 %v448_v14  ;;  %302 = vmatpush.bf16.msra.mxu1 %v452_v15 }
  0x23   : > { %290 = vmatpush.bf16.msra.mxu0 %v440_v20  ;;  %303 = vmatpush.bf16.msra.mxu1 %v444_v21 }
  0x27   : > { %291 = vmatpush.bf16.msra.mxu0 %v432_v26  ;;  %304 = vmatpush.bf16.msra.mxu1 %v436_v27 }
  0x2b   : > { %292 = vmatpush.bf16.msra.mxu0 %v424_v32  ;;  %305 = vmatpush.bf16.msra.mxu1 %v428_v33 }
  0x2f   : > { %293 = vmatpush.bf16.msra.mxu0 %v416_v38  ;;  %306 = vmatpush.bf16.msra.mxu1 %v420_v39 }
  0x32   : > { %453 = vmatmul.msk.bf16.vlgmr.msra.gmra.mxu0 %vm273_vm1, %v206_v40  ;;  %454 = vmatmul.msk.bf16.vlgmr.msra.gmra.mxu1 %vm273_vm1, %v206_v40 }
  0xaf   : > { %v295_v41 = vpop.f32.mrf.mxu0  ;;  %v308_v42 = vpop.f32.mrf.mxu1 }
  0xb0   : > { %v315_v44 = vrot.slane %v308_v42, 4 }
  0xb2   : > { %v317_v45 = vsel %vm316_vm2, %v295_v41, %v315_v44 }
  0xb3   : > { %v319_v46 = vmax.f32 %v312_v43, %v317_v45  ;;  %324 = sbr.rel (%p455_p6) target bundleno = 308 (0x134), region = 40 }
  0xb5   : > { %320 = vst [vmem:[#allocation2] sm:$0xff] %v319_v46 }
  0xb7   : > { %v297_v47 = vpop.f32.mrf.mxu0  ;;  %v310_v48 = vpop.f32.mrf.mxu1 }
  0xb8   : > { %v326_v49 = vld [vmem:[%s618_s2] sm:$0xf]  ;;  %v526_v50 = vmov 0   ;;  %v527_v51 = vmov 839922192  }
  0xb9   : > { %499 = vset.pattern.permute.xlu0 %v526_v50  ;;  %v332_v52 = vunpack.c.l.s4 %v527_v51 }
  0xba   : > { %329 = vperm.xlu0 %499, %v326_v49  }
  0xbb   : > { %v333_v53 = vunpack.c.0.s8 %v332_v52 }
  0xbc   : > { %v325_v55 = vld [vmem:[#allocation2] sm:$0xff] }
 0x12c   : > { %v330_v54 = vpop.permute.xlu0 %329 }
 0x12d   : > { %v334_v56 = vperm.slane %v330_v54, %v333_v53 }
 0x12f   : > { %v336_v57 = vadd.f32 %v334_v56, %v325_v55 }
 0x131   : > { %v337_v58 = vmax.f32 %v336_v57, 0.0 }
 0x133   : > { %338 = vst [vmem:[%s619_s3] sm:$0xff] %v337_v58 }
 0x134 PF: > { %s13_s14 = sadd.s32 1, %s522_s14   ;;  %s620_s12 = smov %s518_s13 }
 0x135   : > { %p10_p7 = scmp.ge.s32.totalorder %s13_s14, 29   ;;  %s621_s13 = smov %s623_s15 }
 0x137   :  { %12 = sbr.rel (!%p10_p7) target bundleno = 2 (0x2), region = 70 }

// kernel: dyadic_cnn3d_forward.4
= control target key start
LH: loop header
LB: loop body
LE: loop exit
PB: predicated region body
PF: predicated region fallthrough
CT: control target
= control target key end

     0   :  { %s477_s12 = smov 0   ;;  %s479_s13 = smov 0   ;;  %s522_s0 = inlined_call_operand.vmem [shape: bf16[27,108,128], index: 0, kind: input, shape index: {}]   ;;  %s523_s1 = inlined_call_operand.vmem [shape: bf16[8,108], index: 1, kind: input, shape index: {}]   ;;  %s524_s2 = inlined_call_operand.vmem [shape: f32[8,1], index: 2, kind: input, shape index: {}]   ;;  %s525_s3 = inlined_call_operand.vmem [shape: f32[8,128], index: 3, kind: output, shape index: {}]  }
   0x1   :  { %s481_s14 = smov 0  }
   0x2 LB: > { %s22_s15 = sadd.s32 1, %s449_s13  ;;  %p360_p0 = scmp.ge.s32.totalorder %s453_s14, 1  ;;  %s453_s14 = sphi %s481_s14, %s13_s14   ;;  %s449_s13 = sphi %s479_s13, %s527_s13   ;;  %s445_s12 = sphi %s477_s12, %s526_s12  }
   0x3   : > { %p23_p1 = scmp.ge.s32.totalorder %s22_s15, 27  ;;  %p154_p2 = scmp.lt.s32.totalorder %s453_s14, 28 }
   0x5   : > { %s529_s15 = smov (%p23_p1, %s22_s15), 0  ;;  %p155_p3 = pnand %p360_p0, %p154_p2 }
   0x6   : > { %p180_p4 = scmp.lt.s32.totalorder (!%p155_p3), %s445_s12, 26  ;;  %p362_p5 = scmp.ne.s32.totalorder (!%p155_p3), %s445_s12, 0 }
   0x7   : > { %158 = sbr.rel (%p155_p3) target bundleno = 307 (0x133), region = 32 }
   0xc   : > { %s181_s16 = scalar_select %p180_p4, %s445_s12, 26 }
   0xd   : > { %196 = sbr.rel (%p362_p5) target bundleno = 20 (0x14), region = 36 }
   0xe   : > { %s403_s17 = smul.u32 56, %s181_s16 }
  0x10   : > { %s187_s20 = scalar_lea.vmem %s522_s0, %s403_s17 }
  0x12   : > { %v455_v0 = vmov -inf  }
  0x13   : > { %197 = vst [vmem:[#allocation2] sm:$0xff] %v455_v0 }
  0x14 PF: > { %v389_v1 = vld [vmem:[%s187_s20 + $0x30] sm:$0xf]  ;;  %v402_v2 = vld [vmem:[%s187_s20 + $0x30] sm:$0x30]  ;;  %vm258_vm0 = vcmask 1045504   ;;  %v401_v5 = vld [vmem:[%s187_s20 + $0x28] sm:$0xff] }
  0x15   : > { %v390_v3 = vor.u32 %v402_v2, %v389_v1  ;;  %v400_v6 = vld [vmem:[%s187_s20 + $0x20] sm:$0xff]  ;;  %v399_v7 = vld [vmem:[%s187_s20 + $0x18] sm:$0xff]  ;;  %v398_v8 = vld [vmem:[%s187_s20 + $0x10] sm:$0xff]  ;;  %vm254_vm1 = vcmask 883712   ;;  %p392_p6 = scmp.ne.s32.totalorder %s445_s12, 26 }
  0x16   : > { %v397_v9 = vld [vmem:[%s187_s20 + $0x8] sm:$0xff]  ;;  %v396_v10 = vld [vmem:[%s187_s20] sm:$0xff] }
  0x17   : > { %v260_v4 = vsel %vm258_vm0, %v390_v3, 0  ;;  %v198_v11 = vld [vmem:[%s523_s1] sm:$0xf] }
  0x18   : > { %263 = vmatpush.bf16.msra.mxu0 %v260_v4 }
  0x1a   : > { %v275_v12 = vld [vmem:[#allocation2] sm:$0xff] }
  0x1c   : > { %264 = vmatpush.bf16.msra.mxu0 %v401_v5 }
  0x20   : > { %265 = vmatpush.bf16.msra.mxu0 %v400_v6 }
  0x24   : > { %266 = vmatpush.bf16.msra.mxu0 %v399_v7 }
  0x28   : > { %267 = vmatpush.bf16.msra.mxu0 %v398_v8 }
  0x2c   : > { %268 = vmatpush.bf16.msra.mxu0 %v397_v9 }
  0x30   : > { %269 = vmatpush.bf16.msra.mxu0 %v396_v10 }
  0x33   : > { %391 = vmatmul.msk.bf16.vlgmr.msra.gmra.mxu0 %vm254_vm1, %v198_v11 }
  0xb0   : > { %v271_v13 = vpop.f32.mrf.mxu0 }
  0xb1   : > { %v276_v14 = vmax.f32 %v275_v12, %v271_v13 }
  0xb3   : > { %277 = vst [vmem:[#allocation2] sm:$0xff] %v276_v14 }
  0xb4   : > { %281 = sbr.rel (%p392_p6) target bundleno = 307 (0x133), region = 40 }
  0xb8   : > { %v273_v15 = vpop.f32.mrf.mxu0 }
  0xb9   : > { %v283_v16 = vld [vmem:[%s524_s2] sm:$0xff]  ;;  %v456_v17 = vmov 0  }
  0xba   : > { %430 = vset.pattern.permute.xlu0 %v456_v17  ;;  %v282_v18 = vld [vmem:[#allocation2] sm:$0xff] }
  0xbb   : > { %286 = vperm.xlu0 %430, %v283_v16  }
 0x12d   : > { %v287_v19 = vpop.permute.xlu0 %286 }
 0x12e   : > { %v289_v20 = vadd.f32 %v287_v19, %v282_v18 }
 0x130   : > { %v290_v21 = vmax.f32 %v289_v20, 0.0 }
 0x132   : > { %291 = vst [vmem:[%s525_s3] sm:$0xff] %v290_v21 }
 0x133 PF: > { %s13_s14 = sadd.s32 1, %s453_s14   ;;  %s526_s12 = smov %s449_s13 }
 0x134   : > { %p10_p7 = scmp.ge.s32.totalorder %s13_s14, 29   ;;  %s527_s13 = smov %s529_s15 }
 0x136   :  { %12 = sbr.rel (!%p10_p7) target bundleno = 2 (0x2), region = 70 }

// kernel: dyadic_cnn3d_forward.5
= control target key start
LH: loop header
LB: loop body
LE: loop exit
PB: predicated region body
PF: predicated region fallthrough
CT: control target
= control target key end

     0   :  { %vm22_vm0 = vcmask 254976   ;;  %vm50_vm4 = vcmask 1024   ;;  %s94_s0 = inlined_call_operand.vmem [shape: f32[2,32], index: 0, kind: input, shape index: {}]   ;;  %s95_s1 = inlined_call_operand.vmem [shape: f32[1,32], index: 1, kind: input, shape index: {}]   ;;  %s96_s2 = inlined_call_operand.<no memory space> [shape: f32[1,1], index: 2, kind: input, shape index: {}]   ;;  %s97_s3 = inlined_call_operand.vmem [shape: f32[2,1], index: 3, kind: output, shape index: {}]  }
   0x1   :  { %v16_v0 = vld [vmem:[%s94_s0] sm:$0x3]  ;;  %v8_v2 = vstv %s96_s2 }
   0x2   :  { %v56_v1 = vld [vmem:[%s95_s1] ss:$0 sm:$0xff]  ;;  %9 = vst [vmem:[#allocation2] sm:$0x1] %v8_v2 }
   0x3   :  { %v21_v3 = vmul.f32 %v56_v1, %v16_v0 }
   0x5   :  { %v23_v4 = vsel %vm22_vm0, %v21_v3, 0.0 }
   0x6   :  { %24 = vadd.xlane.f32.xlu0 %v23_v4 }
   0x9   :  { %v57_v5 = vld [vmem:[#allocation2] ss:$0 sm:$0xff] }
  0x79   :  { %v25_v6 = vpop.xlane.xlu0 %24 }
  0x7a   :  { %v30_v7 = vadd.f32 %v57_v5, %v25_v6 }
  0x7c   :  { %v31_v8 = vsub.f32 0.0, %v30_v7 }
  0x7e   :  { %v32_v9 = vmul.f32 1.442695, %v31_v8 }
  0x80   :  { %58 = vpow2.f32 %v32_v9 }
  0x86   :  { %v59_v10 = vpop.eup %58 }
  0x87   :  { %v34_v11 = vadd.f32 1.0, %v59_v10 }
  0x89   :  { %60 = vrcp.f32 %v34_v11  ;;  %v46_v15 = vand.u32 2147483648, %v34_v11  ;;  %v44_v17 = vand.u32 2147483647, %v34_v11  ;;  %vm40_vm2 = vweird.f32 %v34_v11 }
  0x8b   :  { %v47_v19 = vor.u32 1.1754944e-38, %v46_v15  ;;  %vm45_vm5 = vcmp.eq.f32.partialorder %v44_v17, 8.507059e+37 }
  0x8f   :  { %v61_v12 = vpop.eup %60 }
  0x90   :  { %v36_v13 = vmul.f32 %v61_v12, %v34_v11  ;;  %vm41_vm1 = vweird.f32 %v61_v12 }
  0x91   :  { %vm42_vm3 = vmor %vm40_vm2, %vm41_vm1 }
  0x92   :  { %v37_v14 = vsub.f32 1.0, %v36_v13 }
  0x94   :  { %v38_v16 = vmul.f32 %v61_v12, %v37_v14 }
  0x96   :  { %v39_v18 = vadd.f32 %v61_v12, %v38_v16 }
  0x98   :  { %v43_v20 = vsel %vm42_vm3, %v61_v12, %v39_v18 }
  0x99   :  { %v48_v21 = vsel %vm45_vm5, %v47_v19, %v43_v20 }
  0x9a   :  { %51 = vst.msk [vmem:[%s97_s3] sm:$0x3] %vm50_vm4, %v48_v21 }

</bundles_post_ra>
